<compile_context>
chip_gen: v7x
topology: tpu7x:2x2x1
jax: 0.10.0
libtpu: 0.0.40
codegen_flags: <defaults>
</compile_context>

<pallas_src>
import functools

import jax
import jax.numpy as jnp
import numpy as np
from jax.experimental import pallas as pl
from jax.experimental.pallas import tpu as pltpu

LRELU_SLOPE = 0.2
BN_EPS = 1e-5


# --------------------------------------------------------------------------- #
# Kernels
# --------------------------------------------------------------------------- #
def _conv_taps(main_ref, bnd_ref, w_ref, activation):
    """LeakyReLU + 4x4/stride-2/pad-1 conv for one (image, row-tile).

    main_ref: (1, TH, Wout+1, 4*Cin) bf16 packed rows h*TH .. h*TH+TH-1.
    bnd_ref:  (1, 1,  Wout+1, 4*Cin) bf16 packed row  h*TH+TH (tile boundary).
    w_ref:    (4, 4*Cin, Cout) bf16; first axis indexes the (dh, dw) tap group.
    Returns the f32 accumulator of shape (TH*Wout, Cout).
    """
    _, TH, Wp1, C4 = main_ref.shape
    Wout = Wp1 - 1
    Cout = w_ref.shape[-1]

    main = main_ref[0]                      # (TH, Wout+1, C4) bf16
    bnd = bnd_ref[0]                        # (1,  Wout+1, C4) bf16
    if activation:
        # LeakyReLU in bf16, once per loaded slab; lrelu(0) == 0 so the zero
        # padding is unaffected.
        main = jnp.where(main >= 0, main, LRELU_SLOPE * main)
        bnd = jnp.where(bnd >= 0, bnd, LRELU_SLOPE * bnd)

    # Rows for the dh=1 tap group: the tile shifted down by one packed row.
    if TH > 1:
        src1 = jnp.concatenate([main[1:], bnd], axis=0)   # (TH, Wout+1, C4)
    else:
        src1 = bnd

    acc = jnp.zeros((TH * Wout, Cout), jnp.float32)
    for dh, src in ((0, main), (1, src1)):
        for dw in (0, 1):
            # TODO(synk): the dw=1 sublane-offset slice forces a VMEM relayout;
            # pltpu.roll(src, -1, axis=1) would ride the idle XLU slot instead.
            patch = src[:, dw:dw + Wout, :].reshape(TH * Wout, C4)
            # bf16 operands, f32 accumulation: single-pass MXU issue.
            acc += jnp.dot(patch, w_ref[2 * dh + dw],
                           preferred_element_type=jnp.float32)
    return acc


def _conv_bn_kernel(main_ref, bnd_ref, w_ref, y_ref, sum_ref, ssq_ref, *,
                    activation):
    """Conv + per-image BN statistic accumulation (bias skipped: cancels in BN)."""
    acc = _conv_taps(main_ref, bnd_ref, w_ref, activation)

    @pl.when(pl.program_id(1) == 0)
    def _():
        sum_ref[...] = jnp.zeros_like(sum_ref)
        ssq_ref[...] = jnp.zeros_like(ssq_ref)

    sum_ref[...] += jnp.sum(acc, axis=0, keepdims=True)[None]
    ssq_ref[...] += jnp.sum(acc * acc, axis=0, keepdims=True)[None]
    y_ref[0] = acc.astype(y_ref.dtype)


def _conv_kernel(main_ref, bnd_ref, w_ref, b_ref, y_ref, *, activation):
    """Conv + bias only (batch_norm=False path; no statistics work)."""
    acc = _conv_taps(main_ref, bnd_ref, w_ref, activation)
    acc += b_ref[...]
    y_ref[0] = acc.astype(y_ref.dtype)


def _bn_kernel(y_ref, scale_ref, shift_ref, o_ref):
    """Pure scale/shift normalize; stores the tile transposed (NCHW layout)."""
    y = y_ref[0].astype(jnp.float32)                      # (TH*Wout, Cout)
    o = y * scale_ref[...] + shift_ref[...]
    o_ref[0] = o.T.astype(o_ref.dtype)                    # (Cout, TH*Wout)


# --------------------------------------------------------------------------- #
# Tiling helpers
# --------------------------------------------------------------------------- #
def _vmem_limit_bytes():
    """~half of physical VMEM: 64 MiB on v5e/v6e (128 MiB), 32 MiB on v7x (64 MiB)."""
    try:
        cap = int(getattr(pltpu.get_tpu_info(), "vmem_capacity_bytes", 64 << 20))
    except Exception:
        cap = 64 << 20
    return int(min(96 << 20, max(32 << 20, cap // 2)))


def _pick_row_tile(hout, wout, c4, cout, y_bytes, budget_bytes):
    """Largest row tile TH dividing Hout whose working set fits the budget.

    Alignment: the flattened spatial block TH*Wout sits in the sublane dim of
    the conv output and in the lane dim of the transposed BN output, so it must
    be a multiple of 128 unless TH == Hout (full extent).
    """
    in_elt = 2   # bf16 packed input
    cands = [th for th in range(1, hout + 1)
             if hout % th == 0 and (th == hout or (th * wout) % 128 == 0)]

    def conv_ws(th):
        m = th * wout
        slab = th * (wout + 1) * c4 * in_elt
        return (2 * slab                          # main input, double-buffered
                + 2 * (wout + 1) * c4 * in_elt    # boundary row, double-buffered
                + 2 * 4 * c4 * cout * 2           # bf16 weights, double-buffered
                + 2 * m * cout * y_bytes          # y output, double-buffered
                + m * cout * 4                    # f32 accumulator
                + slab                            # src1 concat copy
                + 2 * m * c4 * in_elt)            # patch slice/reshape temporaries

    def bn_ws(th):
        m = th * wout
        return (2 * m * cout * 2                  # bf16 y read, double-buffered
                + 2 * m * cout * 4                # f32 NCHW write, double-buffered
                + 2 * m * cout * 4)               # cast + transpose temporaries

    fit = [th for th in cands if max(conv_ws(th), bn_ws(th)) <= budget_bytes]
    return max(fit) if fit else min(cands)


# --------------------------------------------------------------------------- #
# Public forward
# --------------------------------------------------------------------------- #
def conv_block_forward(x_nchw, w_oihw, bias, gamma, beta,
                       activation=True, batch_norm=True):
    N, Cin, H, W = x_nchw.shape
    Cout = w_oihw.shape[0]
    assert H % 2 == 0 and W % 2 == 0, "k=4/s=2/p=1 conv here assumes even H, W"
    Hout, Wout = H // 2, W // 2
    C4 = 4 * Cin
    out_dtype = x_nchw.dtype

    # ---- glue: bf16 space-to-depth packing (channels -> lanes) --------------
    x = jnp.transpose(x_nchw, (0, 2, 3, 1)).astype(jnp.bfloat16)       # NHWC bf16
    xpad = jnp.pad(x, ((0, 0), (1, 1), (1, 1), (0, 0)))                # zero pad=1
    # packed[n, i, j, (rp*2+cp)*Cin + c] = xpad[n, 2i+rp, 2j+cp, c]
    packed = xpad.reshape(N, Hout + 1, 2, Wout + 1, 2, Cin)
    packed = packed.transpose(0, 1, 3, 2, 4, 5).reshape(N, Hout + 1, Wout + 1, C4)

    # weights packed as [dh*2+dw, (rp*2+cp)*Cin + cin, cout]; kh=2dh+rp, kw=2dw+cp
    w4 = (w_oihw.reshape(Cout, Cin, 2, 2, 2, 2)
          .transpose(2, 4, 3, 5, 1, 0)
          .reshape(4, C4, Cout)
          .astype(jnp.bfloat16))

    vmem_limit = _vmem_limit_bytes()
    y_bytes = 2 if batch_norm else np.dtype(out_dtype).itemsize
    TH = _pick_row_tile(Hout, Wout, C4, Cout, y_bytes, vmem_limit // 2)
    nh = Hout // TH

    # Tile-boundary packed rows (h+1)*TH, one per row tile: tiny side-car array
    # so the main packed input is DMA'd exactly once (no p0/p1 duplication).
    boundary = packed[:, TH::TH]                       # (N, nh, Wout+1, C4)

    main_spec = pl.BlockSpec((1, TH, Wout + 1, C4), lambda n, h: (n, h, 0, 0))
    bnd_spec = pl.BlockSpec((1, 1, Wout + 1, C4), lambda n, h: (n, h, 0, 0))
    w_spec = pl.BlockSpec((4, C4, Cout), lambda n, h: (0, 0, 0))
    vec_spec = pl.BlockSpec((1, Cout), lambda n, h: (0, 0))
    y_spec = pl.BlockSpec((1, TH * Wout, Cout), lambda n, h: (n, h, 0))
    stat_spec = pl.BlockSpec((1, 1, Cout), lambda n, h: (n, 0, 0))

    if batch_norm:
        y, csum, cssq = pl.pallas_call(
            functools.partial(_conv_bn_kernel, activation=activation),
            out_shape=(jax.ShapeDtypeStruct((N, Hout * Wout, Cout), jnp.bfloat16),
                       jax.ShapeDtypeStruct((N, 1, Cout), jnp.float32),
                       jax.ShapeDtypeStruct((N, 1, Cout), jnp.float32)),
            grid=(N, nh),
            in_specs=[main_spec, bnd_spec, w_spec],
            out_specs=(y_spec, stat_spec, stat_spec),
            compiler_params=pltpu.CompilerParams(
                dimension_semantics=("parallel", "arbitrary"),   # stats resident over h only
                vmem_limit_bytes=vmem_limit),
        )(packed, boundary, w4)

        # Per-channel scale/shift computed once (tiny XLA ops).
        count = float(N * Hout * Wout)
        mean = jnp.sum(csum, axis=(0, 1)) / count
        # TODO(synk): E[y^2] - mean^2 is fine for ~zero-mean conv outputs but is
        # not Welford-stable for data with a large mean.
        var = jnp.maximum(jnp.sum(cssq, axis=(0, 1)) / count - mean * mean, 0.0)
        scale = (gamma.astype(jnp.float32) * jax.lax.rsqrt(var + BN_EPS)).reshape(1, Cout)
        shift = beta.astype(jnp.float32).reshape(1, Cout) - mean.reshape(1, Cout) * scale

        o = pl.pallas_call(
            _bn_kernel,
            out_shape=jax.ShapeDtypeStruct((N, Cout, Hout * Wout), out_dtype),
            grid=(N, nh),
            in_specs=[y_spec, vec_spec, vec_spec],
            out_specs=pl.BlockSpec((1, Cout, TH * Wout), lambda n, h: (n, 0, h)),
            compiler_params=pltpu.CompilerParams(
                dimension_semantics=("parallel", "parallel"),
                vmem_limit_bytes=vmem_limit),
        )(y, scale, shift)
        return o.reshape(N, Cout, Hout, Wout)            # trailing-dim split: free

    # batch_norm=False: conv + bias only, no statistics.
    b2 = bias.reshape(1, Cout).astype(jnp.float32)
    y = pl.pallas_call(
        functools.partial(_conv_kernel, activation=activation),
        out_shape=jax.ShapeDtypeStruct((N, Hout * Wout, Cout), out_dtype),
        grid=(N, nh),
        in_specs=[main_spec, bnd_spec, w_spec, vec_spec],
        out_specs=y_spec,
        compiler_params=pltpu.CompilerParams(
            dimension_semantics=("parallel", "parallel"),
            vmem_limit_bytes=vmem_limit),
    )(packed, boundary, w4, b2)
    # TODO(synk): fold this relayout into the kernel (transposed store) like the BN path.
    return jnp.transpose(y.reshape(N, Hout, Wout, Cout), (0, 3, 1, 2))


# --------------------------------------------------------------------------- #
# Pure-JAX reference (PyTorch ConvBlock forward, training-mode BN)
# --------------------------------------------------------------------------- #
def ref_forward(x, w_oihw, bias, gamma, beta, activation=True, batch_norm=True,
                match_kernel=False):
    """match_kernel=True reproduces the kernel's bf16 operand / bf16-y numerics;
    match_kernel=False is the exact f32 module semantics."""
    lhs, rhs = x, w_oihw
    if match_kernel:
        lhs, rhs = lhs.astype(jnp.bfloat16), rhs.astype(jnp.bfloat16)
    if activation:
        lhs = jnp.where(lhs >= 0, lhs, LRELU_SLOPE * lhs)
    y = jax.lax.conv_general_dilated(
        lhs, rhs, window_strides=(2, 2), padding=((1, 1), (1, 1)),
        dimension_numbers=("NCHW", "OIHW", "NCHW"),
        preferred_element_type=jnp.float32,
        precision=jax.lax.Precision.HIGHEST)
    if not batch_norm:
        return (y + bias[None, :, None, None]).astype(x.dtype)
    if not match_kernel:
        y = y + bias[None, :, None, None]          # cancels in BN; kernel skips it
    mean = jnp.mean(y, axis=(0, 2, 3), keepdims=True)
    if match_kernel:
        var = jnp.maximum(jnp.mean(y * y, axis=(0, 2, 3), keepdims=True) - mean * mean, 0.0)
        y = y.astype(jnp.bfloat16).astype(jnp.float32)   # y carried in bf16 between passes
    else:
        var = jnp.mean((y - mean) ** 2, axis=(0, 2, 3), keepdims=True)
    scale = gamma[None, :, None, None] * jax.lax.rsqrt(var + BN_EPS)
    shift = beta[None, :, None, None] - mean * scale
    return (y * scale + shift).astype(x.dtype)


if __name__ == "__main__":
    key = jax.random.PRNGKey(0)
    kx, kw, kb = jax.random.split(key, 3)

    N, Cin, H, W, Cout = 2, 4, 16, 16, 8
    x = jax.random.normal(kx, (N, Cin, H, W), jnp.float32)
    w = jax.random.normal(kw, (Cout, Cin, 4, 4), jnp.float32) * 0.1   # Conv2d weight (OIHW)
    b = jax.random.normal(kb, (Cout,), jnp.float32) * 0.1             # Conv2d bias
    gamma = jnp.ones((Cout,), jnp.float32)                            # BatchNorm2d default init
    beta = jnp.zeros((Cout,), jnp.float32)

    out = jax.block_until_ready(conv_block_forward(x, w, b, gamma, beta))

    # Tight check against the precision-matched (bf16 operands + bf16 y carry)
    # reference, and a looser check against the exact f32 module semantics
    # (slack covers only bf16 rounding).
    ref_m = ref_forward(x, w, b, gamma, beta, match_kernel=True)
    np.testing.assert_allclose(np.asarray(out), np.asarray(ref_m),
                               rtol=2e-3, atol=2e-3)
    ref_f = ref_forward(x, w, b, gamma, beta)
    np.testing.assert_allclose(np.asarray(out), np.asarray(ref_f),
                               rtol=4e-2, atol=4e-2)

    # Also exercise the activation=False / batch_norm=False (bias-add) path.
    out2 = jax.block_until_ready(
        conv_block_forward(x, w, b, gamma, beta, activation=False, batch_norm=False))
    ref2 = ref_forward(x, w, b, gamma, beta, activation=False, batch_norm=False,
                       match_kernel=True)
    np.testing.assert_allclose(np.asarray(out2), np.asarray(ref2),
                               rtol=2e-3, atol=2e-3)

    print("KERNEL_OK")
</pallas_src>

<mosaic_0001>
module attributes {stable_mosaic.version = 11 : i64} {
  func.func @_conv_bn_kernel(%arg0: i32, %arg1: i32, %arg2: memref<1x8x9x16xbf16, #tpu.memory_space<vmem>>, %arg3: memref<1x1x9x16xbf16, #tpu.memory_space<vmem>>, %arg4: memref<4x16x8xbf16, #tpu.memory_space<vmem>>, %arg5: memref<1x64x8xbf16, #tpu.memory_space<vmem>>, %arg6: memref<1x1x8xf32, #tpu.memory_space<vmem>>, %arg7: memref<1x1x8xf32, #tpu.memory_space<vmem>>) attributes {dimension_semantics = [#tpu.dimension_semantics<parallel>, #tpu.dimension_semantics<arbitrary>], iteration_bounds = array<i64: 2, 1>, scalar_prefetch = 0 : i64, scratch_operands = 0 : i64, tpu.core_type = #tpu.core_type<tc>, window_params = [{transform_indices = @transform_0, window_bounds = array<i64: 1, 8, 9, 16>}, {transform_indices = @transform_1, window_bounds = array<i64: 1, 1, 9, 16>}, {pipeline_mode = #tpu.pipeline_mode<synchronous>, transform_indices = @transform_2, window_bounds = array<i64: 4, 16, 8>}, {transform_indices = @transform_3, window_bounds = array<i64: 1, 64, 8>}, {transform_indices = @transform_4, window_bounds = array<i64: 1, 1, 8>}, {transform_indices = @transform_5, window_bounds = array<i64: 1, 1, 8>}]} {
    %c0 = arith.constant 0 : index
    %c0_0 = arith.constant 0 : index
    %c0_1 = arith.constant 0 : index
    %c0_2 = arith.constant 0 : index
    %0 = vector.load %arg2[%c0, %c0_0, %c0_1, %c0_2] : memref<1x8x9x16xbf16, #tpu.memory_space<vmem>>, vector<1x8x9x16xbf16>
    %1 = vector.shape_cast %0 : vector<1x8x9x16xbf16> to vector<8x9x16xbf16>
    %c0_3 = arith.constant 0 : index
    %c0_4 = arith.constant 0 : index
    %c0_5 = arith.constant 0 : index
    %c0_6 = arith.constant 0 : index
    %2 = vector.load %arg3[%c0_3, %c0_4, %c0_5, %c0_6] : memref<1x1x9x16xbf16, #tpu.memory_space<vmem>>, vector<1x1x9x16xbf16>
    %3 = vector.shape_cast %2 : vector<1x1x9x16xbf16> to vector<1x9x16xbf16>
    %cst = arith.constant 0.000000e+00 : bf16
    %4 = vector.broadcast %cst : bf16 to vector<8x9x16xbf16>
    %5 = arith.cmpf oge, %1, %4 : vector<8x9x16xbf16>
    %cst_7 = arith.constant 2.001950e-01 : bf16
    %6 = vector.broadcast %cst_7 : bf16 to vector<8x9x16xbf16>
    %7 = arith.mulf %6, %1 : vector<8x9x16xbf16>
    %8 = arith.select %5, %1, %7 : vector<8x9x16xi1>, vector<8x9x16xbf16>
    %cst_8 = arith.constant 0.000000e+00 : bf16
    %9 = vector.broadcast %cst_8 : bf16 to vector<1x9x16xbf16>
    %10 = arith.cmpf oge, %3, %9 : vector<1x9x16xbf16>
    %cst_9 = arith.constant 2.001950e-01 : bf16
    %11 = vector.broadcast %cst_9 : bf16 to vector<1x9x16xbf16>
    %12 = arith.mulf %11, %3 : vector<1x9x16xbf16>
    %13 = arith.select %10, %3, %12 : vector<1x9x16xi1>, vector<1x9x16xbf16>
    %14 = vector.extract_strided_slice %8 {offsets = [1, 0, 0], sizes = [7, 9, 16], strides = [1, 1, 1]} : vector<8x9x16xbf16> to vector<7x9x16xbf16>
    %15 = tpu.concatenate %14, %13 in 0 : vector<7x9x16xbf16>, vector<1x9x16xbf16> -> vector<8x9x16xbf16>
    %cst_10 = arith.constant 0.000000e+00 : f32
    %16 = vector.broadcast %cst_10 : f32 to vector<64x8xf32>
    %17 = vector.extract_strided_slice %8 {offsets = [0, 0, 0], sizes = [8, 8, 16], strides = [1, 1, 1]} : vector<8x9x16xbf16> to vector<8x8x16xbf16>
    %18 = vector.shape_cast %17 : vector<8x8x16xbf16> to vector<64x16xbf16>
    %c0_11 = arith.constant 0 : index
    %c0_12 = arith.constant 0 : index
    %c0_13 = arith.constant 0 : index
    %19 = vector.load %arg4[%c0_11, %c0_12, %c0_13] : memref<4x16x8xbf16, #tpu.memory_space<vmem>>, vector<1x16x8xbf16>
    %20 = vector.shape_cast %19 : vector<1x16x8xbf16> to vector<16x8xbf16>
    %cst_14 = arith.constant dense<0.000000e+00> : vector<64x8xf32>
    %21 = tpu.matmul %18, %20, %cst_14 {dimension_numbers = #tpu.dot_dimension_numbers<[1], [0], [0], [1], [0, 0, 1, 1], [], []>} : vector<64x16xbf16>, vector<16x8xbf16>, vector<64x8xf32> -> vector<64x8xf32>
    %22 = arith.addf %16, %21 : vector<64x8xf32>
    %23 = vector.extract_strided_slice %8 {offsets = [0, 1, 0], sizes = [8, 8, 16], strides = [1, 1, 1]} : vector<8x9x16xbf16> to vector<8x8x16xbf16>
    %24 = vector.shape_cast %23 : vector<8x8x16xbf16> to vector<64x16xbf16>
    %c1 = arith.constant 1 : index
    %c0_15 = arith.constant 0 : index
    %c0_16 = arith.constant 0 : index
    %25 = vector.load %arg4[%c1, %c0_15, %c0_16] : memref<4x16x8xbf16, #tpu.memory_space<vmem>>, vector<1x16x8xbf16>
    %26 = vector.shape_cast %25 : vector<1x16x8xbf16> to vector<16x8xbf16>
    %cst_17 = arith.constant dense<0.000000e+00> : vector<64x8xf32>
    %27 = tpu.matmul %24, %26, %cst_17 {dimension_numbers = #tpu.dot_dimension_numbers<[1], [0], [0], [1], [0, 0, 1, 1], [], []>} : vector<64x16xbf16>, vector<16x8xbf16>, vector<64x8xf32> -> vector<64x8xf32>
    %28 = arith.addf %22, %27 : vector<64x8xf32>
    %29 = vector.extract_strided_slice %15 {offsets = [0, 0, 0], sizes = [8, 8, 16], strides = [1, 1, 1]} : vector<8x9x16xbf16> to vector<8x8x16xbf16>
    %30 = vector.shape_cast %29 : vector<8x8x16xbf16> to vector<64x16xbf16>
    %c2 = arith.constant 2 : index
    %c0_18 = arith.constant 0 : index
    %c0_19 = arith.constant 0 : index
    %31 = vector.load %arg4[%c2, %c0_18, %c0_19] : memref<4x16x8xbf16, #tpu.memory_space<vmem>>, vector<1x16x8xbf16>
    %32 = vector.shape_cast %31 : vector<1x16x8xbf16> to vector<16x8xbf16>
    %cst_20 = arith.constant dense<0.000000e+00> : vector<64x8xf32>
    %33 = tpu.matmul %30, %32, %cst_20 {dimension_numbers = #tpu.dot_dimension_numbers<[1], [0], [0], [1], [0, 0, 1, 1], [], []>} : vector<64x16xbf16>, vector<16x8xbf16>, vector<64x8xf32> -> vector<64x8xf32>
    %34 = arith.addf %28, %33 : vector<64x8xf32>
    %35 = vector.extract_strided_slice %15 {offsets = [0, 1, 0], sizes = [8, 8, 16], strides = [1, 1, 1]} : vector<8x9x16xbf16> to vector<8x8x16xbf16>
    %36 = vector.shape_cast %35 : vector<8x8x16xbf16> to vector<64x16xbf16>
    %c3 = arith.constant 3 : index
    %c0_21 = arith.constant 0 : index
    %c0_22 = arith.constant 0 : index
    %37 = vector.load %arg4[%c3, %c0_21, %c0_22] : memref<4x16x8xbf16, #tpu.memory_space<vmem>>, vector<1x16x8xbf16>
    %38 = vector.shape_cast %37 : vector<1x16x8xbf16> to vector<16x8xbf16>
    %cst_23 = arith.constant dense<0.000000e+00> : vector<64x8xf32>
    %39 = tpu.matmul %36, %38, %cst_23 {dimension_numbers = #tpu.dot_dimension_numbers<[1], [0], [0], [1], [0, 0, 1, 1], [], []>} : vector<64x16xbf16>, vector<16x8xbf16>, vector<64x8xf32> -> vector<64x8xf32>
    %40 = arith.addf %34, %39 : vector<64x8xf32>
    %c0_i32 = arith.constant 0 : i32
    %41 = arith.cmpi eq, %arg1, %c0_i32 : i32
    %42 = arith.extui %41 : i1 to i32
    %c0_i32_24 = arith.constant 0 : i32
    %43 = arith.cmpi ne, %42, %c0_i32_24 : i32
    scf.if %43 {
      %cst_42 = arith.constant 0.000000e+00 : f32
      %61 = vector.broadcast %cst_42 : f32 to vector<1x1x8xf32>
      %c0_43 = arith.constant 0 : index
      %c0_44 = arith.constant 0 : index
      %c0_45 = arith.constant 0 : index
      %62 = vector.load %arg6[%c0_43, %c0_44, %c0_45] : memref<1x1x8xf32, #tpu.memory_space<vmem>>, vector<1x1x8xf32>
      tpu.vector_store %arg6[%c0_43, %c0_44, %c0_45], %61 {strides = array<i32>} : memref<1x1x8xf32, #tpu.memory_space<vmem>>, vector<1x1x8xf32>,
      %cst_46 = arith.constant 0.000000e+00 : f32
      %63 = vector.broadcast %cst_46 : f32 to vector<1x1x8xf32>
      %c0_47 = arith.constant 0 : index
      %c0_48 = arith.constant 0 : index
      %c0_49 = arith.constant 0 : index
      %64 = vector.load %arg7[%c0_47, %c0_48, %c0_49] : memref<1x1x8xf32, #tpu.memory_space<vmem>>, vector<1x1x8xf32>
      tpu.vector_store %arg7[%c0_47, %c0_48, %c0_49], %63 {strides = array<i32>} : memref<1x1x8xf32, #tpu.memory_space<vmem>>, vector<1x1x8xf32>,
    } else {
    }
    %c0_25 = arith.constant 0 : index
    %c0_26 = arith.constant 0 : index
    %c0_27 = arith.constant 0 : index
    %44 = vector.load %arg6[%c0_25, %c0_26, %c0_27] : memref<1x1x8xf32, #tpu.memory_space<vmem>>, vector<1x1x8xf32>
    %cst_28 = arith.constant dense<0.000000e+00> : vector<8xf32>
    %45 = vector.multi_reduction <add>, %40, %cst_28 [0] : vector<64x8xf32> to vector<8xf32>
    %46 = vector.shape_cast %45 : vector<8xf32> to vector<1x8xf32>
    %47 = vector.shape_cast %46 : vector<1x8xf32> to vector<1x1x8xf32>
    %48 = arith.addf %44, %47 : vector<1x1x8xf32>
    %c0_29 = arith.constant 0 : index
    %c0_30 = arith.constant 0 : index
    %c0_31 = arith.constant 0 : index
    %49 = vector.load %arg6[%c0_29, %c0_30, %c0_31] : memref<1x1x8xf32, #tpu.memory_space<vmem>>, vector<1x1x8xf32>
    tpu.vector_store %arg6[%c0_29, %c0_30, %c0_31], %48 {strides = array<i32>} : memref<1x1x8xf32, #tpu.memory_space<vmem>>, vector<1x1x8xf32>,
    %c0_32 = arith.constant 0 : index
    %c0_33 = arith.constant 0 : index
    %c0_34 = arith.constant 0 : index
    %50 = vector.load %arg7[%c0_32, %c0_33, %c0_34] : memref<1x1x8xf32, #tpu.memory_space<vmem>>, vector<1x1x8xf32>
    %51 = arith.mulf %40, %40 : vector<64x8xf32>
    %cst_35 = arith.constant dense<0.000000e+00> : vector<8xf32>
    %52 = vector.multi_reduction <add>, %51, %cst_35 [0] : vector<64x8xf32> to vector<8xf32>
    %53 = vector.shape_cast %52 : vector<8xf32> to vector<1x8xf32>
    %54 = vector.shape_cast %53 : vector<1x8xf32> to vector<1x1x8xf32>
    %55 = arith.addf %50, %54 : vector<1x1x8xf32>
    %c0_36 = arith.constant 0 : index
    %c0_37 = arith.constant 0 : index
    %c0_38 = arith.constant 0 : index
    %56 = vector.load %arg7[%c0_36, %c0_37, %c0_38] : memref<1x1x8xf32, #tpu.memory_space<vmem>>, vector<1x1x8xf32>
    tpu.vector_store %arg7[%c0_36, %c0_37, %c0_38], %55 {strides = array<i32>} : memref<1x1x8xf32, #tpu.memory_space<vmem>>, vector<1x1x8xf32>,
    %57 = arith.truncf %40 : vector<64x8xf32> to vector<64x8xbf16>
    %c0_39 = arith.constant 0 : index
    %c0_40 = arith.constant 0 : index
    %c0_41 = arith.constant 0 : index
    %58 = vector.load %arg5[%c0_39, %c0_40, %c0_41] : memref<1x64x8xbf16, #tpu.memory_space<vmem>>, vector<1x64x8xbf16>
    %59 = vector.shape_cast %58 : vector<1x64x8xbf16> to vector<64x8xbf16>
    %60 = vector.shape_cast %57 : vector<64x8xbf16> to vector<1x64x8xbf16>
    tpu.vector_store %arg5[%c0_39, %c0_40, %c0_41], %60 {strides = array<i32>} : memref<1x64x8xbf16, #tpu.memory_space<vmem>>, vector<1x64x8xbf16>,
    return
  }
  func.func @transform_0(%arg0: i32, %arg1: i32) -> (i32, i32, i32, i32) {
    %c0_i32 = arith.constant 0 : i32
    %c0_i32_0 = arith.constant 0 : i32
    %c0_i32_1 = arith.constant 0 : i32
    return %arg0, %arg1, %c0_i32, %c0_i32_0 : i32, i32, i32, i32
  }
  func.func @transform_1(%arg0: i32, %arg1: i32) -> (i32, i32, i32, i32) {
    %c0_i32 = arith.constant 0 : i32
    %c0_i32_0 = arith.constant 0 : i32
    %c0_i32_1 = arith.constant 0 : i32
    return %arg0, %arg1, %c0_i32, %c0_i32_0 : i32, i32, i32, i32
  }
  func.func @transform_2(%arg0: i32, %arg1: i32) -> (i32, i32, i32) {
    %c0_i32 = arith.constant 0 : i32
    %c0_i32_0 = arith.constant 0 : i32
    %c0_i32_1 = arith.constant 0 : i32
    %c0_i32_2 = arith.constant 0 : i32
    return %c0_i32, %c0_i32_0, %c0_i32_1 : i32, i32, i32
  }
  func.func @transform_3(%arg0: i32, %arg1: i32) -> (i32, i32, i32) {
    %c0_i32 = arith.constant 0 : i32
    %c0_i32_0 = arith.constant 0 : i32
    return %arg0, %arg1, %c0_i32 : i32, i32, i32
  }
  func.func @transform_4(%arg0: i32, %arg1: i32) -> (i32, i32, i32) {
    %c0_i32 = arith.constant 0 : i32
    %c0_i32_0 = arith.constant 0 : i32
    %c0_i32_1 = arith.constant 0 : i32
    return %arg0, %c0_i32, %c0_i32_0 : i32, i32, i32
  }
  func.func @transform_5(%arg0: i32, %arg1: i32) -> (i32, i32, i32) {
    %c0_i32 = arith.constant 0 : i32
    %c0_i32_0 = arith.constant 0 : i32
    %c0_i32_1 = arith.constant 0 : i32
    return %arg0, %c0_i32, %c0_i32_0 : i32, i32, i32
  }
}

</mosaic_0001>

<bundles_post_ra>
// kernel: tpu_custom_call.1
= control target key start
LH: loop header
LB: loop body
LE: loop exit
PB: predicated region body
PF: predicated region fallthrough
CT: control target
= control target key end

     0   :  { %11 = vsyncpa [#allocation3], 0  ;;  %s1979_s0 = inlined_call_operand.vmem [shape: bf16[2,9,9,16], index: 0, kind: input, shape index: {}]   ;;  %s1980_s1 = inlined_call_operand.vmem [shape: bf16[2,1,9,16], index: 1, kind: input, shape index: {}]   ;;  %s1981_s2 = inlined_call_operand.vmem [shape: bf16[4,16,8], index: 2, kind: input, shape index: {}]   ;;  %s1982_s3 = inlined_call_operand.vmem [shape: bf16[2,64,8], index: 3, kind: output, shape index: {0}]   ;;  %s1983_s4 = inlined_call_operand.hbm [shape: f32[2,1,8], index: 4, kind: output, shape index: {1}]   ;;  %s1984_s5 = inlined_call_operand.hbm [shape: f32[2,1,8], index: 5, kind: output, shape index: {2}]  }
   0x1   :  { %13 = vsyncpa [#allocation3 + $0x1], 0 }
   0x2   :  { %14 = vsyncpa [#allocation5], 0 }
   0x3   :  { %16 = vsyncpa [#allocation5 + $0x1], 0  ;;  %s1627_s18 = smov 0   ;;  %s1629_s19 = smov 0  }
   0x4   :  { %s1631_s20 = smov 0   ;;  %s1633_s21 = smov 0  }
   0x5   :  { %s1635_s22 = smov 0   ;;  %s1637_s23 = smov 0  }
   0x6 LB: > { %s1258_s24 = sadd.s32 4294967295, %s1592_s23   ;;  %s1259_s25 = sadd.s32 4294967294, %s1592_s23   ;;  %s1592_s23 = sphi %s1637_s23, %s22_s23   ;;  %s1588_s22 = sphi %s1635_s22, %s1993_s22   ;;  %s1584_s21 = sphi %s1633_s21, %s1992_s21   ;;  %s1580_s20 = sphi %s1631_s20, %s1991_s20   ;;  %s1576_s19 = sphi %s1629_s19, %s1990_s19   ;;  %s1572_s18 = sphi %s1627_s18, %s1989_s18  }
   0x7   : > { %s34_s26 = sadd.s32 1, %s1588_s22  ;;  %s146_s27 = sadd.s32 1, %s1580_s20 }
   0x8   : > { %p36_p0 = scmp.ge.s32.totalorder %s34_s26, 2  ;;  %p156_p1 = scmp.ne.s32.totalorder %s1580_s20, %s1576_s19 }
   0x9   : > { %p157_p2 = scmp.eq.s32.totalorder %s1258_s24, 1  ;;  %p162_p3 = scmp.ne.s32.totalorder %s1576_s19, %s1572_s18 }
   0xa   : > { %s1995_s26 = smov (%p36_p0, %s34_s26), 0  ;;  %p163_p5 = scmp.eq.s32.totalorder %s1259_s25, 1 }
   0xb   : > { %p1667_p4 = por %p157_p2, %p156_p1  ;;  %s143_s29 = ssub.s32 %s1588_s22, %s1995_s26 }
   0xc   : > { %p1262_p6 = scmp.ge.s32.totalorder %s1592_s23, 1  ;;  %p144_p7 = scmp.eq.s32.totalorder %s143_s29, 0 }
   0xd   : > { %p1674_p8 = por %p163_p5, %p162_p3  ;;  %p246_p9 = scmp.lt.s32.totalorder %s1592_s23, 3 }
   0xe   : > { %s1680_s6 = scalar_select %p144_p7, %s1580_s20, %s146_s27  }
   0xf   : > { %p247_p10 = pnand %p1262_p6, %p246_p9 }
  0x10   : > { %v1478_v0 = vld [vmem:[%s1981_s2 + $0x10] sm:$0xff] (!%p247_p10)   ;;  %p311_p11 = scmp.lt.s32.totalorder (!%p247_p10), %s1584_s21, 1  ;;  %v1479_v1 = vld [vmem:[%s1981_s2 + $0x8] sm:$0xff] (!%p247_p10)   ;;  %v1695_v2 = vld [vmem:[%s1981_s2] sm:$0xff] (!%p247_p10)   ;;  %vm557_vm0 = vcmask (!%p247_p10), 130048   ;;  %s1840_s9 = sand.u32 (!%p247_p10), 1, %s1576_s19  }
  0x11   : > { %250 = sbr.rel (%p247_p10) target bundleno = 360 (0x168), region = 32  ;;  %1372 = vmatprep.subr.bf16.mxu0 (!%p247_p10), %v1478_v0  ;;  %1352 = vmatprep.subr.bf16.mxu1 (!%p247_p10), %v1479_v1  ;;  %v1481_v3 = vld [vmem:[%s1981_s2 + $0x18] sm:$0xff] (!%p247_p10)   ;;  %vm421_vm7 = vsmask.f32 (!%p247_p10), 3328  ;;  %vm422_vm8 = vsmask.f32 (!%p247_p10), 7440 }
  0x12   : > { %1373 = vmatpush3.bf16.msra.mxu0 (!%p247_p10), %v1478_v0  ;;  %1353 = vmatpush3.bf16.msra.mxu1 (!%p247_p10), %v1479_v1  ;;  %s1843_s10 = scalar_lea.vmem (!%p247_p10), [#allocation2], %s1840_s9  ;;  %s1848_s12 = scalar_lea.vmem (!%p247_p10), [#allocation4], %s1840_s9 }
  0x13   : > { %1362 = vmatprep.subr.bf16.mxu1 (!%p247_p10), %v1695_v2  ;;  %1382 = vmatprep.subr.bf16.mxu0 (!%p247_p10), %v1481_v3  ;;  %s1087_s17 = sshll.u32 (!%p247_p10), %s1843_s10, 4  ;;  %s1100_s24 = sshll.u32 (!%p247_p10), %s1848_s12, 4  ;;  %s1900_s17 = int_to_ptr.vmem [resolvable:$true] %s1087_s17  ;;  %s1909_s24 = int_to_ptr.vmem [resolvable:$true] %s1100_s24 }
  0x14   : > { %s1595_s15 = smov (!%p247_p10), [#allocation2]  }
  0x18   : > { %s1690_s11 = scalar_select %p311_p11, %s1584_s21, 1 }
  0x1a   : > { %s1416_s14 = smul.u32 72, %s1690_s11  ;;  %s1322_s27 = sshll.u32 %s1690_s11, 3 }
  0x1b   : > { %s1746_s8 = scalar_lea.vmem %s1980_s1, %s1322_s27  ;;  %s1323_s13 = sshll.u32 %s1690_s11, 5 }
  0x1c   : > { %s1705_s25 = scalar_lea.vmem %s1979_s0, %s1416_s14  ;;  %v363_v44 = vld [vmem:[%s1746_s8] sm:$0xf]  ;;  %s1856_s16 = scalar_lea.vmem %s1982_s3, %s1323_s13 }
  0x1d   : > { %v349_v4 = vld [vmem:[%s1705_s25 + $0x8] sm:$0xf]  ;;  %v351_v5 = vld [vmem:[%s1705_s25 + $0x10] sm:$0xf]  ;;  %v353_v6 = vld [vmem:[%s1705_s25 + $0x18] sm:$0xf] }
  0x1e   : > { %vm367_vm1 = vcmp.ge.bf16.partialorder %v349_v4, 0  ;;  %vm369_vm2 = vcmp.ge.bf16.partialorder %v351_v5, 0  ;;  %vm371_vm3 = vcmp.ge.bf16.partialorder %v353_v6, 0  ;;  %v383_v7 = vmul.bf16 1045249613, %v349_v4  ;;  %s1318_s11 = sshll.u32 %s1584_s21, 4 }
  0x1f   : > { %v385_v8 = vmul.bf16 1045249613, %v351_v5  ;;  %v387_v9 = vmul.bf16 1045249613, %v353_v6  ;;  %v355_v10 = vld [vmem:[%s1705_s25 + $0x20] sm:$0xf]  ;;  %s1898_s29 = scalar_lea.hbm %s1983_s4, %s1318_s11 }
  0x20   : > { %v1711_v11 = vsel %vm367_vm1, %v349_v4, %v383_v7  ;;  %vm373_vm4 = vcmp.ge.bf16.partialorder %v355_v10, 0  ;;  %v389_v12 = vmul.bf16 1045249613, %v355_v10  ;;  %v357_v13 = vld [vmem:[%s1705_s25 + $0x28] sm:$0xf]  ;;  %vm413_vm15 = vcmp.ge.bf16.partialorder %v363_v44, 0  ;;  %vm1773_vm1 = vmor %vm421_vm7, %vm422_vm8 }
  0x21   : > { %v1715_v14 = vsel %vm369_vm2, %v351_v5, %v385_v8  ;;  %v439_v15 = vshrl.u32 %v1711_v11, 16  ;;  %v442_v16 = vshll.u32 %v1711_v11, 16  ;;  %v359_v17 = vld [vmem:[%s1705_s25 + $0x30] sm:$0xf]  ;;  %v347_v18 = vld [vmem:[%s1705_s25] sm:$0xf]  ;;  %v1721_v19 = vsel %vm371_vm3, %v353_v6, %v387_v9 }
  0x22   : > { %v453_v20 = vshrl.u32 %v1715_v14, 16  ;;  %v456_v21 = vshll.u32 %v1715_v14, 16  ;;  %v1290_v22 = vcombine.low %v1711_v11, %v1715_v14  ;;  %v348_v23 = vld [vmem:[%s1705_s25 + $0x4] sm:$0x1]  ;;  %v350_v24 = vld [vmem:[%s1705_s25 + $0xc] sm:$0x1]  ;;  %v1729_v25 = vsel %vm373_vm4, %v355_v10, %v389_v12 }
  0x23   : > { %vm375_vm5 = vcmp.ge.bf16.partialorder %v357_v13, 0  ;;  %vm377_vm6 = vcmp.ge.bf16.partialorder %v359_v17, 0  ;;  %v391_v26 = vmul.bf16 1045249613, %v357_v13  ;;  %v352_v27 = vld [vmem:[%s1705_s25 + $0x14] sm:$0x1]  ;;  %v1291_v33 = vcombine.low %v1721_v19, %v1729_v25 }
  0x24   : > { %v455_v28 = vrot.slane %v453_v20, 4  ;;  %v458_v29 = vrot.slane %v456_v21, 5  ;;  %1374 = vmatprep.mubr.msk.bf16.mxu0 %vm557_vm0, %v1290_v22  ;;  %v481_v30 = vshrl.u32 %v1729_v25, 16  ;;  %v484_v31 = vshll.u32 %v1729_v25, 16  ;;  %v354_v32 = vld [vmem:[%s1705_s25 + $0x1c] sm:$0x1] }
  0x25   : > { %v393_v34 = vmul.bf16 1045249613, %v359_v17  ;;  %v1738_v35 = vsel %vm375_vm5, %v357_v13, %v391_v26  ;;  %v356_v36 = vld [vmem:[%s1705_s25 + $0x24] sm:$0x1]  ;;  %vm365_vm9 = vcmp.ge.bf16.partialorder %v347_v18, 0  ;;  %vm366_vm10 = vcmp.ge.bf16.partialorder %v348_v23, 0  ;;  %1375 = vmatmul.mubr.msk.bf16.vlgmr.msra.gmra.mrb[0].mxu0 %vm557_vm0, %v1291_v33 }
  0x26   : > { %v495_v37 = vshrl.u32 %v1738_v35, 16  ;;  %v498_v38 = vshll.u32 %v1738_v35, 16  ;;  %vm368_vm11 = vcmp.ge.bf16.partialorder %v350_v24, 0  ;;  %vm370_vm12 = vcmp.ge.bf16.partialorder %v352_v27, 0  ;;  %1383 = vmatpush3.bf16.msra.mxu0 %v1481_v3  ;;  %v361_v12 = vld [vmem:[%s1705_s25 + $0x38] sm:$0xf] }
  0x27   : > { %v1752_v39 = vsel %vm377_vm6, %v359_v17, %v393_v34  ;;  %vm372_vm13 = vcmp.ge.bf16.partialorder %v354_v32, 0  ;;  %vm374_vm14 = vcmp.ge.bf16.partialorder %v356_v36, 0  ;;  %v381_v43 = vmul.bf16 1045249613, %v347_v18  ;;  %s1067_s13 = scalar_lea.sflag [#allocation3], %s1840_s9  ;;  %s1482_s14 = scalar_lea.vmem %s1900_s17, 16 }
  0x28   : > { %v509_v40 = vshrl.u32 %v1752_v39, 16  ;;  %v512_v41 = vshll.u32 %v1752_v39, 16  ;;  %v1292_v42 = vcombine.low %v1738_v35, %v1752_v39  ;;  %v382_v45 = vmul.bf16 1045249613, %v348_v23  ;;  %p1483_p12 = scmp.ne.s32.totalorder %s1900_s17, %s1482_s14 }
  0x29   : > { %v384_v46 = vmul.bf16 1045249613, %v350_v24  ;;  %v386_v47 = vmul.bf16 1045249613, %v352_v27  ;;  %v459_v48 = vor.u32 %v458_v29, %v455_v28  ;;  %v388_v49 = vmul.bf16 1045249613, %v354_v32 }
  0x2a   : > { %1378 = vmatprep.mubr.msk.bf16.mxu0 %vm557_vm0, %v1292_v42  ;;  %v390_v50 = vmul.bf16 1045249613, %v356_v36  ;;  %v1761_v51 = vsel %vm365_vm9, %v347_v18, %v381_v43  ;;  %v441_v52 = vrot.slane %v439_v15, 4  ;;  %v398_v53 = vsel %vm366_vm10, %v348_v23, %v382_v45  ;;  %p1484_p13 = pnand %p1483_p12, %p1667_p4 }
  0x2b   : > { %v400_v54 = vsel %vm368_vm11, %v350_v24, %v384_v46  ;;  %v402_v55 = vsel %vm370_vm12, %v352_v27, %v386_v47  ;;  %v425_v56 = vshrl.u32 %v1761_v51, 16  ;;  %v404_v57 = vsel %vm372_vm13, %v354_v32, %v388_v49  ;;  %v364_v32 = vld [vmem:[%s1746_s8 + $0x4] sm:$0x1]  ;;  %v358_v47 = vld [vmem:[%s1705_s25 + $0x2c] sm:$0x1]  ;;  %s1907_s8 = scalar_lea.hbm %s1984_s5, %s1318_s11 }
  0x2c   : > { %v406_v58 = vsel %vm374_vm14, %v356_v36, %v390_v50  ;;  %v428_v59 = vshll.u32 %v1761_v51, 16  ;;  %v434_v60 = vshll.u32 %v398_v53, 16  ;;  %v444_v62 = vrot.slane %v442_v16, 5  ;;  %p1485_p0 = pneg %p1484_p13 }
  0x2d   : > { %v427_v61 = vrot.slane %v425_v56, 4  ;;  %v448_v63 = vshll.u32 %v400_v54, 16  ;;  %v460_v0 = vrot.slane %v459_v48, 4  ;;  %v462_v4 = vshll.u32 %v402_v55, 16 }
  0x2e   : > { %v430_v1 = vrot.slane %v428_v59, 5  ;;  %v436_v3 = vrot.slane %v434_v60, 5  ;;  %v467_v5 = vshrl.u32 %v1721_v19, 16  ;;  %v445_v7 = vor.u32 %v444_v62, %v441_v52 }
  0x2f   : > { %v450_v8 = vrot.slane %v448_v63, 5  ;;  %v470_v9 = vshll.u32 %v1721_v19, 16  ;;  %v476_v10 = vshll.u32 %v404_v57, 16  ;;  %v464_v15 = vrot.slane %v462_v4, 5  ;;  %v360_v57 = vld [vmem:[%s1705_s25 + $0x34] sm:$0x1] }
  0x30   : > { %v431_v13 = vor.u32 %v430_v1, %v427_v61  ;;  %v469_v16 = vrot.slane %v467_v5, 4  ;;  %v483_v17 = vrot.slane %v481_v30, 4  ;;  %v446_v18 = vrot.slane %v445_v7, 4 }
  0x31   : > { %v472_v20 = vrot.slane %v470_v9, 5  ;;  %v478_v21 = vrot.slane %v476_v10, 5  ;;  %v486_v22 = vrot.slane %v484_v31, 5  ;;  %v465_v24 = vsel %vm1773_vm1, %v460_v0, %v464_v15 }
  0x32   : > { %v432_v23 = vrot.slane %v431_v13, 4  ;;  %v490_v26 = vshll.u32 %v406_v58, 16  ;;  %vm379_vm2 = vcmp.ge.bf16.partialorder %v361_v12, 0  ;;  %v451_v27 = vsel %vm1773_vm1, %v446_v18, %v450_v8  ;;  %v362_v58 = vld [vmem:[%s1705_s25 + $0x3c] sm:$0x1] }
  0x33   : > { %v473_v28 = vor.u32 %v472_v20, %v469_v16  ;;  %v487_v29 = vor.u32 %v486_v22, %v483_v17  ;;  %v395_v30 = vmul.bf16 1045249613, %v361_v12  ;;  %v1301_v36 = vcombine.low %v451_v27, %v465_v24 }
  0x34   : > { %v437_v33 = vsel %vm1773_vm1, %v432_v23, %v436_v3  ;;  %v492_v34 = vrot.slane %v490_v26, 5  ;;  %v415_v31 = vmul.bf16 1045249613, %v363_v44  ;;  %v416_v48 = vmul.bf16 1045249613, %v364_v32 }
  0x35   : > { %v474_v42 = vrot.slane %v473_v28, 4  ;;  %v488_v43 = vrot.slane %v487_v29, 4  ;;  %v1270_v45 = vcombine.low %v437_v33, %v451_v27  ;;  %v1788_v46 = vsel %vm379_vm2, %v361_v12, %v395_v30 }
  0x36   : > { %v417_v49 = vsel %vm413_vm15, %v363_v44, %v415_v31  ;;  %v523_v50 = vshrl.u32 %v1788_v46, 16  ;;  %v526_v52 = vshll.u32 %v1788_v46, 16  ;;  %vm376_vm3 = vcmp.ge.bf16.partialorder %v358_v47, 0 }
  0x37   : > { %v479_v53 = vsel %vm1773_vm1, %v474_v42, %v478_v21  ;;  %v493_v54 = vsel %vm1773_vm1, %v488_v43, %v492_v34  ;;  %1354 = vmatprep.mubr.msk.bf16.mxu1 %vm557_vm0, %v1270_v45  ;;  %v1293_v55 = vcombine.low %v1788_v46, %v417_v49  ;;  %v839_v56 = vshrl.u32 %v417_v49, 16 }
  0x38   : > { %v1271_v59 = vcombine.low %v465_v24, %v479_v53  ;;  %v1302_v60 = vcombine.low %v479_v53, %v493_v54  ;;  %v842_v44 = vshll.u32 %v417_v49, 16  ;;  %v392_v62 = vmul.bf16 1045249613, %v358_v47 }
  0x39   : > { %1379 = vmatmul.mubr.msk.bf16.gmra.mrb[4].mxu0 %vm557_vm0, %v1293_v55  ;;  %v841_v61 = vrot.slane %v839_v56, 4  ;;  %v497_v63 = vrot.slane %v495_v37, 4  ;;  %v500_v0 = vrot.slane %v498_v38, 5  ;;  %vm378_vm4 = vcmp.ge.bf16.partialorder %v360_v57, 0 }
  0x3a   : > { %v844_v1 = vrot.slane %v842_v44, 5  ;;  %1355 = vmatmul.mubr.msk.bf16.vlgmr.msra.gmra.mrb[0].mxu1 %vm557_vm0, %v1271_v59  ;;  %1384 = vmatprep.mubr.msk.bf16.mxu0 %vm557_vm0, %v1301_v36  ;;  %vm380_vm5 = vcmp.ge.bf16.partialorder %v362_v58, 0  ;;  %v394_v3 = vmul.bf16 1045249613, %v360_v57  ;;  %v408_v4 = vsel %vm376_vm3, %v358_v47, %v392_v62 }
  0x3b   : > { %1363 = vmatpush3.bf16.msra.mxu1 %v1695_v2  ;;  %v501_v5 = vor.u32 %v500_v0, %v497_v63  ;;  %v396_v7 = vmul.bf16 1045249613, %v362_v58  ;;  %v511_v8 = vrot.slane %v509_v40, 4  ;;  %v504_v37 = vshll.u32 %v408_v4, 16 }
  0x3c   : > { %v410_v9 = vsel %vm378_vm4, %v360_v57, %v394_v3  ;;  %v514_v38 = vrot.slane %v512_v41, 5  ;;  %v525_v10 = vrot.slane %v523_v50, 4  ;;  %v528_v16 = vrot.slane %v526_v52, 5 }
  0x3d   : > { %v502_v12 = vrot.slane %v501_v5, 4  ;;  %v412_v13 = vsel %vm380_vm5, %v362_v58, %v396_v7  ;;  %v518_v15 = vshll.u32 %v410_v9, 16  ;;  %v506_v17 = vrot.slane %v504_v37, 5 }
  0x3e   : > { %v515_v18 = vor.u32 %v514_v38, %v511_v8  ;;  %v532_v20 = vshll.u32 %v412_v13, 16  ;;  %v529_v21 = vor.u32 %v528_v16, %v525_v10  ;;  %vm414_vm6 = vcmp.ge.bf16.partialorder %v364_v32, 0 }
  0x3f   : > { %v520_v2 = vrot.slane %v518_v15, 5  ;;  %v845_v22 = vor.u32 %v844_v1, %v841_v61  ;;  %v507_v40 = vsel %vm1773_vm1, %v502_v12, %v506_v17  ;;  %v418_v26 = vsel %vm414_vm6, %v364_v32, %v416_v48 }
  0x40   : > { %v516_v23 = vrot.slane %v515_v18, 4  ;;  %v534_v24 = vrot.slane %v532_v20, 5  ;;  %v1272_v27 = vcombine.low %v493_v54, %v507_v40  ;;  %v530_v41 = vrot.slane %v529_v21, 4 }
  0x41   : > { %1385 = vmatmul.mubr.msk.bf16.vlgmr.msra.gmra.mrb[0].mxu0 %vm557_vm0, %v1302_v60  ;;  %v846_v28 = vrot.slane %v845_v22, 4  ;;  %v848_v29 = vshll.u32 %v418_v26, 16  ;;  %v1279_v36 = vcombine.low %v1761_v51, %v1711_v11  ;;  %v1280_v45 = vcombine.low %v1715_v14, %v1721_v19 }
  0x42   : > { %v521_v30 = vsel %vm1773_vm1, %v516_v23, %v520_v2  ;;  %1358 = vmatprep.mubr.msk.bf16.mxu1 %vm557_vm0, %v1272_v27  ;;  %v535_v33 = vsel %vm1773_vm1, %v530_v41, %v534_v24  ;;  %v1281_v11 = vcombine.low %v1729_v25, %v1738_v35  ;;  %v1282_v51 = vcombine.low %v1752_v39, %v1788_v46 }
  0x43   : > { %v1303_v34 = vcombine.low %v507_v40, %v521_v30  ;;  %v850_v32 = vrot.slane %v848_v29, 5  ;;  %v1273_v31 = vcombine.low %v521_v30, %v535_v33  ;;  %vm955_vm7 = vcmask 57344  }
  0x44   : > { %v1594_v14 = vmov 0.0   ;;  %vm959_vm8 = vcmask 64512  }
  0x45   : > { %1388 = vmatprep.mubr.msk.bf16.mxu0 %vm557_vm0, %v1303_v34  ;;  %v851_v42 = vsel %vm1773_vm1, %v846_v28, %v850_v32  ;;  %1359 = vmatmul.mubr.msk.bf16.gmra.mrb[4].mxu1 %vm557_vm0, %v1273_v31  ;;  %956 = vst.msk [vmem:[%s1843_s10] sm:$0x1] %vm955_vm7, %v1594_v14  ;;  %957 = vst.msk [vmem:[%s1848_s12] sm:$0x1] %vm955_vm7, %v1594_v14 }
  0x46   : > { %v1304_v43 = vcombine.low %v535_v33, %v851_v42  ;;  %1364 = vmatprep.mubr.msk.bf16.mxu1 %vm557_vm0, %v1279_v36 }
  0x49   : > { %1389 = vmatmul.mubr.msk.bf16.gmra.mrb[4].mxu0 %vm557_vm0, %v1304_v43 }
  0x4d   : > { %1365 = vmatmul.mubr.msk.bf16.vlgmr.msra.gmra.mrb[0].mxu1 %vm557_vm0, %v1280_v45 }
  0x4e   : > { %1368 = vmatprep.mubr.msk.bf16.mxu1 %vm557_vm0, %v1281_v11 }
  0x55   : > { %1369 = vmatmul.mubr.msk.bf16.gmra.mrb[4].mxu1 %vm557_vm0, %v1282_v51  ;;  %vm1048_vm0 = vcmask 60416  }
 0x114   : > { %v1386_v19 = vpop.f32.mrb[0].mxu0 }
 0x115   : > { %v912_v25 = vpop.f32.mrb[1].mxu0 }
 0x116   : > { %v1387_v35 = vpop.f32.mrb[2].mxu0 }
 0x117   : > { %v915_v39 = vpop.f32.mrb[3].mxu0 }
 0x11c   : > { %v1390_v6 = vpop.f32.mrb[4].mxu0 }
 0x11d   : > { %v928_v46 = vpop.f32.mrb[5].mxu0 }
 0x11e   : > { %v1391_v47 = vpop.f32.mrb[6].mxu0 }
 0x11f   : > { %v931_v48 = vpop.f32.mrb[7].mxu0 }
 0x120   : > { %v1366_v49 = vpop.f32.mrb[0].mxu1 }
 0x121   : > { %v1392_v50 = vadd.f32 %v1386_v19, %v1366_v49  ;;  %v707_v52 = vpop.f32.mrb[1].mxu1 }
 0x122   : > { %v1393_v53 = vadd.f32 %v912_v25, %v707_v52  ;;  %v1367_v54 = vpop.f32.mrb[2].mxu1 }
 0x123   : > { %v1326_v55 = vpack.c.bf16 %v1392_v50, %v1392_v50  ;;  %v1394_v56 = vadd.f32 %v1387_v35, %v1367_v54  ;;  %v710_v57 = vpop.f32.mrb[3].mxu1  ;;  %v987_v44 = vmul.f32 %v1392_v50, %v1392_v50  ;;  %v963_v5 = vsel %vm959_vm8, %v1392_v50, 0.0 }
 0x124   : > { %v985_v58 = vmul.f32 %v1393_v53, %v1393_v53  ;;  %v1324_v59 = vpack.c.bf16 %v1393_v53, %v1393_v53  ;;  %v1395_v60 = vadd.f32 %v915_v39, %v710_v57  ;;  %v960_v62 = vsel %vm959_vm8, %v1393_v53, 0.0  ;;  %v958_v57 = vld [vmem:[%s1843_s10] sm:$0x1] }
 0x125   : > { %1051 = vst.msk [vmem:[%s1856_s16 + $0x8] sm:$0xf] %vm1048_vm0, %v1326_v55  ;;  %v1327_v61 = vpack.c.bf16 %v1394_v56, %v1394_v56  ;;  %v988_v3 = vmul.f32 %v1394_v56, %v1394_v56  ;;  %v996_v13 = vsel %vm959_vm8, %v987_v44, 0.0  ;;  %v965_v17 = vsel %vm959_vm8, %v1394_v56, 0.0 }
 0x126   : > { %1049 = vst.msk [vmem:[%s1856_s16] sm:$0xf] %vm1048_vm0, %v1324_v59  ;;  %v961_v63 = vsel %vm959_vm8, %v1395_v60, 0.0  ;;  %v986_v0 = vmul.f32 %v1395_v60, %v1395_v60  ;;  %v1325_v1 = vpack.c.bf16 %v1395_v60, %v1395_v60  ;;  %v993_v7 = vsel %vm959_vm8, %v985_v58, 0.0  ;;  %v984_v60 = vld [vmem:[%s1848_s12] sm:$0x1] }
 0x127   : > { %1052 = vst.msk [vmem:[%s1856_s16 + $0xc] sm:$0xf] %vm1048_vm0, %v1327_v61  ;;  %v962_v4 = vadd.f32 %v961_v63, %v960_v62  ;;  %v998_v18 = vsel %vm959_vm8, %v988_v3, 0.0 }
 0x128   : > { %v994_v8 = vsel %vm959_vm8, %v986_v0, 0.0  ;;  %1050 = vst.msk [vmem:[%s1856_s16 + $0x4] sm:$0xf] %vm1048_vm0, %v1325_v1  ;;  %v1370_v37 = vpop.f32.mrb[4].mxu1 }
 0x129   : > { %v964_v9 = vadd.f32 %v963_v5, %v962_v4  ;;  %v995_v38 = vadd.f32 %v994_v8, %v993_v7  ;;  %v1396_v10 = vadd.f32 %v1390_v6, %v1370_v37  ;;  %v723_v12 = vpop.f32.mrb[5].mxu1 }
 0x12a   : > { %v1397_v15 = vadd.f32 %v928_v46, %v723_v12  ;;  %v1371_v16 = vpop.f32.mrb[6].mxu1 }
 0x12b   : > { %v997_v20 = vadd.f32 %v996_v13, %v995_v38  ;;  %v1330_v2 = vpack.c.bf16 %v1396_v10, %v1396_v10  ;;  %v726_v21 = vpop.f32.mrb[7].mxu1  ;;  %v966_v22 = vadd.f32 %v965_v17, %v964_v9  ;;  %v1398_v27 = vadd.f32 %v1391_v47, %v1371_v16 }
 0x12c   : > { %v967_v40 = vsel %vm959_vm8, %v1397_v15, 0.0  ;;  %v989_v23 = vmul.f32 %v1397_v15, %v1397_v15  ;;  %v1328_v24 = vpack.c.bf16 %v1397_v15, %v1397_v15  ;;  %v1399_v41 = vadd.f32 %v931_v48, %v726_v21 }
 0x12d   : > { %1055 = vst.msk [vmem:[%s1856_s16 + $0x18] sm:$0xf] %vm1048_vm0, %v1330_v2  ;;  %v999_v26 = vadd.f32 %v998_v18, %v997_v20  ;;  %v968_v28 = vadd.f32 %v967_v40, %v966_v22  ;;  %v1331_v33 = vpack.c.bf16 %v1398_v27, %v1398_v27  ;;  %v991_v34 = vmul.f32 %v1396_v10, %v1396_v10 }
 0x12e   : > { %v1000_v29 = vsel %vm959_vm8, %v989_v23, 0.0  ;;  %1053 = vst.msk [vmem:[%s1856_s16 + $0x10] sm:$0xf] %vm1048_vm0, %v1328_v24  ;;  %v969_v36 = vsel %vm959_vm8, %v1399_v41, 0.0  ;;  %v990_v32 = vmul.f32 %v1399_v41, %v1399_v41  ;;  %v1329_v31 = vpack.c.bf16 %v1399_v41, %v1399_v41 }
 0x12f   : > { %v1001_v30 = vadd.f32 %v1000_v29, %v999_v26  ;;  %1056 = vst.msk [vmem:[%s1856_s16 + $0x1c] sm:$0xf] %vm1048_vm0, %v1331_v33  ;;  %v970_v42 = vadd.f32 %v969_v36, %v968_v28  ;;  %v971_v43 = vsel %vm959_vm8, %v1396_v10, 0.0  ;;  %v992_v45 = vmul.f32 %v1398_v27, %v1398_v27 }
 0x130   : > { %v1002_v11 = vsel %vm959_vm8, %v990_v32, 0.0  ;;  %1054 = vst.msk [vmem:[%s1856_s16 + $0x14] sm:$0xf] %vm1048_vm0, %v1329_v31  ;;  %v1004_v19 = vsel %vm959_vm8, %v991_v34, 0.0  ;;  %v973_v25 = vsel %vm959_vm8, %v1398_v27, 0.0  ;;  %s1486_s16 = sshll.u32 %s1595_s15, 4  ;;  %s1487_s16 = int_to_ptr.vmem [resolvable:$false] %s1486_s16 }
 0x131   : > { %v972_v51 = vadd.f32 %v971_v43, %v970_v42  ;;  %v1003_v14 = vadd.f32 %v1002_v11, %v1001_v30  ;;  %v1006_v6 = vsel %vm959_vm8, %v992_v45, 0.0  ;;  %s1488_s25 = scalar_lea.vmem %s1487_s16, 32  ;;  %p1489_p1 = scmp.lt.s32.totalorder %s1900_s17, %s1487_s16 }
 0x132   : > { %p1490_p2 = scmp.lt.s32.totalorder %s1488_s25, %s1482_s14 }
 0x133   : > { %v974_v35 = vadd.f32 %v973_v25, %v972_v51  ;;  %v1005_v39 = vadd.f32 %v1004_v19, %v1003_v14 }
 0x134   : > { %p1491_p3 = por %p1490_p2, %p1489_p1 }
 0x135   : > { %v975_v46 = vrot.slane %v974_v35, 4  ;;  %v1007_v47 = vadd.f32 %v1006_v6, %v1005_v39 }
 0x136   : > { %p1492_p5 = pnand %p1491_p3, %p1485_p0 }
 0x137   : > { %v976_v48 = vadd.f32 %v975_v46, %v974_v35  ;;  %v1008_v49 = vrot.slane %v1007_v47, 4 }
 0x139   : > { %v977_v50 = vrot.slane %v976_v48, 2  ;;  %v1009_v52 = vadd.f32 %v1008_v49, %v1007_v47 }
 0x13b   : > { %v978_v53 = vadd.f32 %v977_v50, %v976_v48  ;;  %v1010_v54 = vrot.slane %v1009_v52, 2 }
 0x13d   : > { %v979_v55 = vrot.slane %v978_v53, 1  ;;  %v1011_v56 = vadd.f32 %v1010_v54, %v1009_v52 }
 0x13f   : > { %v980_v58 = vadd.f32 %v979_v55, %v978_v53  ;;  %v1012_v59 = vrot.slane %v1011_v56, 1 }
 0x141   : > { %v981_v44 = vadd.f32 %v980_v58, %v958_v57  ;;  %v1013_v61 = vadd.f32 %v1012_v59, %v1011_v56 }
 0x143   : > { %983 = vst.msk [vmem:[%s1843_s10] sm:$0x1] %vm955_vm7, %v981_v44  ;;  %v1014_v62 = vadd.f32 %v1013_v61, %v984_v60 }
 0x144   : > { %1495 = shalt.err (!%p1492_p5)
}
 0x145   : > { %s1496_s10 = scalar_lea.hbm %s1898_s29, 16  ;;  %s1500_s21 = scalar_lea.hbm %s1983_s4, 32 }
 0x146   : > { %p1497_p6 = scmp.ne.s32.totalorder %s1898_s29, %s1496_s10  ;;  %p1501_p10 = scmp.lt.u32.totalorder %s1898_s29, %s1983_s4 }
 0x147   : > { %p1502_p11 = scmp.lt.u32.totalorder %s1500_s21, %s1496_s10  ;;  %p1504_p13 = scmp.lt.u32.totalorder %s1496_s10, %s1898_s29 }
 0x148   : > { %p1498_p7 = pnand %p1497_p6, %p1667_p4 }
 0x149   : > { %p1503_p12 = por %p1502_p11, %p1501_p10 }
 0x14a   : > { %p1499_p9 = pneg %p1498_p7 }
 0x14b   : > { %p1505_p0 = por %p1504_p13, %p1503_p12 }
 0x14d   : > { %p1506_p1 = pnand %p1505_p0, %p1499_p9 }
 0x14f   : > { %1509 = shalt.err (!%p1506_p1)
}
 0x150   : > { %1417 = dma.vmem_to_hbm [thread:$0]  (%p1667_p4), %s1900_s17, 16, %s1898_s29, %s1067_s13   ;;  %1015 = vst.msk [vmem:[%s1848_s12] sm:$0x1] %vm955_vm7, %v1014_v62 }
 0x151   : > { %s1071_s14 = scalar_lea.sflag [#allocation5], %s1840_s9  ;;  %s1510_s16 = scalar_lea.vmem %s1909_s24, 16 }
 0x152   : > { %p1511_p2 = scmp.ne.s32.totalorder %s1909_s24, %s1510_s16  ;;  %s1596_s25 = smov [#allocation4]  }
 0x153   : > { %s1514_s10 = sshll.u32 %s1596_s25, 4  ;;  %s1515_s10 = int_to_ptr.vmem [resolvable:$false] %s1514_s10 }
 0x154   : > { %p1512_p3 = pnand %p1511_p2, %p1667_p4  ;;  %s1516_s11 = scalar_lea.vmem %s1515_s10, 32 }
 0x155   : > { %p1517_p6 = scmp.lt.s32.totalorder %s1909_s24, %s1515_s10  ;;  %p1518_p7 = scmp.lt.s32.totalorder %s1516_s11, %s1510_s16 }
 0x156   : > { %p1513_p5 = pneg %p1512_p3 }
 0x157   : > { %p1519_p9 = por %p1518_p7, %p1517_p6 }
 0x159   : > { %p1520_p10 = pnand %p1519_p9, %p1513_p5 }
 0x15b   : > { %1523 = shalt.err (!%p1520_p10)
}
 0x15c   : > { %s1524_s9 = scalar_lea.hbm %s1907_s8, 16  ;;  %s1528_s29 = scalar_lea.hbm %s1984_s5, 32 }
 0x15d   : > { %p1525_p11 = scmp.ne.s32.totalorder %s1907_s8, %s1524_s9  ;;  %p1529_p0 = scmp.lt.u32.totalorder %s1907_s8, %s1984_s5 }
 0x15e   : > { %p1530_p1 = scmp.lt.u32.totalorder %s1528_s29, %s1524_s9  ;;  %p1532_p3 = scmp.lt.u32.totalorder %s1524_s9, %s1907_s8 }
 0x15f   : > { %p1526_p12 = pnand %p1525_p11, %p1667_p4 }
 0x160   : > { %p1531_p2 = por %p1530_p1, %p1529_p0 }
 0x161   : > { %p1527_p13 = pneg %p1526_p12 }
 0x162   : > { %p1533_p5 = por %p1532_p3, %p1531_p2 }
 0x164   : > { %p1534_p6 = pnand %p1533_p5, %p1527_p13 }
 0x166   : > { %1537 = shalt.err (!%p1534_p6)
}
 0x167   : > { %1418 = dma.vmem_to_hbm [thread:$0]  (%p1667_p4), %s1909_s24, 16, %s1907_s8, %s1071_s14  }
 0x168 PF: > { %p1428_p7 = scmp.ge.s32.totalorder %s1592_s23, 2  ;;  %s1124_s21 = sand.u32 1, %s1572_s18  }
 0x169   : > { %s1125_s7 = scalar_lea.sflag [#allocation3], %s1124_s21 }
 0x16a   : > { %p1422_p9 = pnand %p1428_p7, %p1674_p8 }
 0x16c   : > { %1563 = dma.done.wait (!%p1422_p9), %s1125_s7, 16  }
 0x16d   : > { %1565 = vsyncadd (!%p1422_p9), %s1125_s7, 4294967280  ;;  %s1133_s15 = scalar_lea.sflag [#allocation5], %s1124_s21 }
 0x16e   : > { %1567 = dma.done.wait (!%p1422_p9), %s1133_s15, 16  }
 0x16f   : > { %1569 = vsyncadd (!%p1422_p9), %s1133_s15, 4294967280  ;;  %s22_s23 = sadd.s32 1, %s1592_s23   ;;  %s1989_s18 = smov %s1576_s19 }
 0x170   : > { %p19_p10 = scmp.ge.s32.totalorder %s22_s23, 4   ;;  %s1990_s19 = smov %s1580_s20 }
 0x171   : > { %s1991_s20 = smov %s1680_s6  ;;  %s1992_s21 = smov %s1588_s22 }
 0x172   : > { %s1993_s22 = smov %s1995_s26  ;;  %21 = sbr.rel (!%p19_p10) target bundleno = 6 (0x6), region = 106 }
 0x179   :  { %1137 = vsyncpa [#allocation3], 1 }
 0x17a   :  { %1139 = vsyncpa [#allocation3 + $0x1], 1 }
 0x17b   :  { %1140 = vsyncpa [#allocation5], 1 }
 0x17c   :  { %1142 = vsyncpa [#allocation5 + $0x1], 1 }

</bundles_post_ra>
